<compile_context>
chip_gen: v7x
topology: tpu7x:2x2x1
jax: 0.10.0
libtpu: 0.0.40
codegen_flags: <defaults>
</compile_context>

<pallas_src>
import math
from functools import partial

import jax
import jax.numpy as jnp
from jax.experimental import pallas as pl
from jax.experimental.pallas import tpu as pltpu


def make_positional_encoding(embed_dim: int, max_len: int = 5000) -> jnp.ndarray:
    """Reference-only buffer construction, identical to the PyTorch __init__."""
    position = jnp.arange(0, max_len, dtype=jnp.float32)[:, None]          # (max_len, 1)
    div_term = jnp.exp(
        jnp.arange(0, embed_dim, 2, dtype=jnp.float32)
        * (-math.log(10000.0) / embed_dim)
    )                                                                      # (embed_dim/2,)
    pe = jnp.zeros((max_len, embed_dim), dtype=jnp.float32)
    pe = pe.at[:, 0::2].set(jnp.sin(position * div_term))
    pe = pe.at[:, 1::2].set(jnp.cos(position * div_term))
    # unsqueeze(0).transpose(0, 1) -> (max_len, 1, embed_dim)
    return pe[:, None, :]


def _add_pe_kernel(x_ref, o_ref, *, batch: int, embed_dim: int):
    """x_ref / o_ref: (ts, lt) VMEM tile of the lane-dense (S, B*E) view."""
    ts, lt = x_ref.shape
    seq0 = pl.program_id(0) * ts          # absolute first sequence row of this tile
    lane0 = pl.program_id(1) * lt         # absolute first lane (0 unless lane-tiled)

    # Row-only quantity at (ts, 1): absolute sequence position per sublane row.
    pos = (jax.lax.broadcasted_iota(jnp.int32, (ts, 1), 0) + seq0).astype(jnp.float32)

    neg_2ln_over_e = -2.0 * math.log(10000.0) / embed_dim
    half_pi = 0.5 * math.pi

    def lane_row(width, base):
        # Lane-only quantities at (1, width), hoisted off the sublane axis:
        #   inv_freq[2k] = inv_freq[2k+1] = exp(2k * -ln(1e4)/E)
        #   phase       = 0 (even lane -> sin) or pi/2 (odd lane -> cos)
        lane = jax.lax.broadcasted_iota(jnp.int32, (1, width), 1) + base
        lane_e = lane if batch == 1 else lane % embed_dim
        k = (lane_e >> 1).astype(jnp.float32)
        inv_freq = jnp.exp(k * neg_2ln_over_e)
        phase = jnp.where((lane_e & 1) == 0, 0.0, half_pi).astype(jnp.float32)
        return inv_freq, phase

    if batch > 1 and embed_dim % 128 == 0 and lt == batch * embed_dim:
        # Full row in one lane tile with 128-aligned embed slices: compute pe
        # once per sequence row (ts, E) and add it to each batch slice.
        # -> 1/B trig per x element, no pe replication, full-width vld/vst.
        inv_freq, phase = lane_row(embed_dim, 0)
        pe = jnp.sin(pos * inv_freq + phase)                 # (ts, E); sin(a+pi/2)==cos(a)
        for b in range(batch):
            lo = b * embed_dim
            x_b = x_ref[:, lo:lo + embed_dim].astype(jnp.float32)
            o_ref[:, lo:lo + embed_dim] = (x_b + pe).astype(o_ref.dtype)
    else:
        # General path: batch replication folded into the (1, lt) lane row via
        # lane % E (hoisted), single trig per element, one full-width store.
        inv_freq, phase = lane_row(lt, lane0)
        pe = jnp.sin(pos * inv_freq + phase)                 # (ts, lt)
        o_ref[...] = (x_ref[...].astype(jnp.float32) + pe).astype(o_ref.dtype)


def positional_encoding_forward(
    x: jnp.ndarray,
    *,
    max_len: int = 5000,
    row_tile: int | None = None,
    lane_tile: int | None = None,
    target_tile_bytes: int = 2 * 1024 * 1024,
    donate: bool = False,
) -> jnp.ndarray:
    """x: (S, B, E). Returns x + pe[:S] (pe computed in-kernel). Any float dtype."""
    S, B, E = x.shape
    if S > max_len:
        raise ValueError(f"seq_len {S} exceeds max_len {max_len}")
    if E % 2 != 0:
        # Same failure mode as the PyTorch module (odd embed_dim is unsupported).
        raise ValueError(f"embed_dim must be even, got {E}")

    dt = jnp.dtype(x.dtype)
    itemsize = dt.itemsize
    sub = max(8, 32 // itemsize)          # sublane packing: 8 f32, 16 bf16, 32 int8/fp8
    row_width = B * E
    row_bytes = row_width * itemsize
    # Lane-dense 2-D view: seq on sublanes, flattened (batch, embed) on lanes.
    # Collapsing contiguous minor dims -> no copy for standard row-major inputs.
    x2d = x.reshape(S, row_width)

    # ---- lane tiling: only when even a minimal seq tile would blow the VMEM budget ----
    if lane_tile is None:
        if sub * row_bytes > target_tile_bytes and row_width > 128:
            lt = ((target_tile_bytes // (sub * itemsize)) // 128) * 128
            lane_tile = max(128, min(lt, row_width))
        else:
            lane_tile = row_width
    else:
        lane_tile = min(lane_tile, row_width)
        if lane_tile < row_width and lane_tile % 128 != 0:
            raise ValueError("lane_tile must be a multiple of 128 when it tiles the row")
    n_lane = pl.cdiv(row_width, lane_tile)

    # ---- sequence tiling: ~target_tile_bytes of x per grid step ----
    if row_tile is not None:
        ts = row_tile
    else:
        ts = max(sub, ((target_tile_bytes // max(lane_tile * itemsize, 1)) // sub) * sub)
    if ts >= S:
        # Guarantee a >=2-step grid for mid/large single-tile inputs so both
        # v7x TensorCores get work (no-op on v5e/v6e, 1 TC).
        if n_lane == 1 and S >= 2 * sub and S * row_bytes > (512 * 1024):
            ts = min(S, ((pl.cdiv(S, 2) + sub - 1) // sub) * sub)
        else:
            ts = S                        # full extent: always a legal block
    else:
        ts = max(sub, (ts // sub) * sub)  # partial blocks must be sublane-aligned
    n_seq = pl.cdiv(S, ts)                # ragged tails handled by masked boundary blocks

    uses_slice_path = (B > 1 and E % 128 == 0 and lane_tile == row_width)
    trig_count = S * E if (uses_slice_path or B == 1) else S * row_width
    cost = pl.CostEstimate(
        flops=S * B * E,                               # one add per element
        transcendentals=trig_count + E,                # one sin per pe element + exp row
        bytes_accessed=2 * S * B * E * itemsize,       # read x, write out
    )

    out2d = pl.pallas_call(
        partial(_add_pe_kernel, batch=B, embed_dim=E),
        out_shape=jax.ShapeDtypeStruct((S, row_width), x.dtype),
        grid=(n_seq, n_lane),
        in_specs=[pl.BlockSpec((ts, lane_tile), lambda i, j: (i, j))],
        out_specs=pl.BlockSpec((ts, lane_tile), lambda i, j: (i, j)),
        compiler_params=pltpu.CompilerParams(
            dimension_semantics=("parallel", "parallel"),
            vmem_limit_bytes=32 << 20,
        ),
        cost_estimate=cost,
        input_output_aliases=({0: 0} if donate else {}),
    )(x2d)

    return out2d.reshape(S, B, E)


if __name__ == "__main__":
    key = jax.random.PRNGKey(0)

    def run_case(name, shape, dtype, max_len, case_i, **kw):
        x = jax.random.normal(jax.random.fold_in(key, case_i), shape, dtype=dtype)
        out = jax.block_until_ready(
            positional_encoding_forward(x, max_len=max_len, **kw)
        )
        S, B, E = shape
        pe = make_positional_encoding(E, max_len=max_len)[:S]          # (S, 1, E)
        ref = (x.astype(jnp.float32) + pe).astype(dtype)
        assert out.shape == x.shape and out.dtype == x.dtype, f"shape/dtype ({name})"
        tol = 1e-4 if dtype == jnp.float32 else 5e-2   # sin(a+pi/2) vs cos(a): few ULP
        assert jnp.allclose(out.astype(jnp.float32), ref.astype(jnp.float32),
                            atol=tol, rtol=tol), f"mismatch vs reference ({name})"

    # 1: canonical small shape, single-tile grid, general (lane % E) path.
    run_case("basic", (8, 2, 32), jnp.float32, 64, 1)
    # 2: multi-step parallel grid with ragged seq tail (masked boundary block).
    run_case("ragged-seq-tail", (200, 2, 32), jnp.float32, 256, 2, row_tile=64)
    # 3: E % 128 == 0 -> per-batch 128-aligned slice path (1/B trig per element).
    run_case("batch-slice-path", (16, 2, 128), jnp.float32, 32, 3)
    # 4: explicit lane tiling (grid = (3, 2)) exercising the lane0 offset logic.
    run_case("lane-tiled", (24, 2, 128), jnp.float32, 32, 4, row_tile=8, lane_tile=128)
    # 5: bf16 input exercising the dtype-aware sublane alignment / cast path.
    run_case("bf16", (32, 2, 64), jnp.bfloat16, 64, 5)

    print("KERNEL_OK")
</pallas_src>

<mosaic_0001>
module attributes {stable_mosaic.version = 11 : i64} {
  func.func @_add_pe_kernel(%arg0: i32, %arg1: i32, %arg2: memref<8x64xf32, #tpu.memory_space<vmem>>, %arg3: memref<8x64xf32, #tpu.memory_space<vmem>>) attributes {dimension_semantics = [#tpu.dimension_semantics<parallel>, #tpu.dimension_semantics<parallel>], iteration_bounds = array<i64: 1, 1>, scalar_prefetch = 0 : i64, scratch_operands = 0 : i64, tpu.core_type = #tpu.core_type<tc>, window_params = [{transform_indices = @transform_0, window_bounds = array<i64: 8, 64>}, {transform_indices = @transform_1, window_bounds = array<i64: 8, 64>}]} {
    %c8_i32 = arith.constant 8 : i32
    %0 = arith.muli %arg0, %c8_i32 : i32
    %c64_i32 = arith.constant 64 : i32
    %1 = arith.muli %arg1, %c64_i32 : i32
    %2 = tpu.iota {dimensions = array<i32: 0>} : vector<8x1xi32>
    %3 = vector.broadcast %0 : i32 to vector<8x1xi32>
    %4 = arith.addi %2, %3 : vector<8x1xi32>
    %5 = arith.sitofp %4 : vector<8x1xi32> to vector<8x1xf32>
    %6 = tpu.iota {dimensions = array<i32: 1>} : vector<1x64xi32>
    %7 = vector.broadcast %1 : i32 to vector<1x64xi32>
    %8 = arith.addi %6, %7 : vector<1x64xi32>
    %c32_i32 = arith.constant 32 : i32
    %c0_i32 = arith.constant 0 : i32
    %9 = arith.cmpi eq, %c32_i32, %c0_i32 : i32
    %c1_i32 = arith.constant 1 : i32
    %10 = arith.select %9, %c1_i32, %c32_i32 : i32
    %11 = vector.broadcast %10 : i32 to vector<1x64xi32>
    %12 = arith.remsi %8, %11 : vector<1x64xi32>
    %c0_i32_0 = arith.constant 0 : i32
    %13 = vector.broadcast %c0_i32_0 : i32 to vector<1x64xi32>
    %14 = arith.cmpi ne, %12, %13 : vector<1x64xi32>
    %c0_i32_1 = arith.constant 0 : i32
    %15 = vector.broadcast %c0_i32_1 : i32 to vector<1x64xi32>
    %16 = arith.cmpi slt, %12, %15 : vector<1x64xi32>
    %c0_i32_2 = arith.constant 0 : i32
    %17 = arith.cmpi slt, %10, %c0_i32_2 : i32
    %18 = vector.broadcast %17 : i1 to vector<1x64xi1>
    %19 = vector.broadcast %18 : vector<1x64xi1> to vector<1x64xi1>
    %20 = arith.xori %16, %19 : vector<1x64xi1>
    %21 = arith.andi %20, %14 : vector<1x64xi1>
    %22 = vector.broadcast %10 : i32 to vector<1x64xi32>
    %23 = arith.addi %12, %22 : vector<1x64xi32>
    %24 = arith.select %21, %23, %12 : vector<1x64xi1>, vector<1x64xi32>
    %c1_i32_3 = arith.constant 1 : i32
    %25 = vector.broadcast %c1_i32_3 : i32 to vector<1x64xi32>
    %26 = arith.shrsi %24, %25 : vector<1x64xi32>
    %27 = arith.sitofp %26 : vector<1x64xi32> to vector<1x64xf32>
    %cst = arith.constant -0.575646281 : f32
    %28 = vector.broadcast %cst : f32 to vector<1x64xf32>
    %29 = arith.mulf %27, %28 : vector<1x64xf32>
    %30 = math.exp %29 : vector<1x64xf32>
    %c1_i32_4 = arith.constant 1 : i32
    %31 = vector.broadcast %c1_i32_4 : i32 to vector<1x64xi32>
    %32 = arith.andi %24, %31 : vector<1x64xi32>
    %c0_i32_5 = arith.constant 0 : i32
    %33 = vector.broadcast %c0_i32_5 : i32 to vector<1x64xi32>
    %34 = arith.cmpi eq, %32, %33 : vector<1x64xi32>
    %cst_6 = arith.constant 0.000000e+00 : f32
    %cst_7 = arith.constant 1.57079637 : f32
    %35 = vector.broadcast %cst_6 : f32 to vector<1x64xf32>
    %36 = vector.broadcast %cst_7 : f32 to vector<1x64xf32>
    %37 = arith.select %34, %35, %36 : vector<1x64xi1>, vector<1x64xf32>
    %38 = vector.broadcast %5 : vector<8x1xf32> to vector<8x64xf32>
    %39 = vector.broadcast %30 : vector<1x64xf32> to vector<8x64xf32>
    %40 = arith.mulf %38, %39 : vector<8x64xf32>
    %41 = vector.broadcast %37 : vector<1x64xf32> to vector<8x64xf32>
    %42 = arith.addf %40, %41 : vector<8x64xf32>
    %43 = math.sin %42 : vector<8x64xf32>
    %c0 = arith.constant 0 : index
    %c0_8 = arith.constant 0 : index
    %44 = vector.load %arg2[%c0, %c0_8] : memref<8x64xf32, #tpu.memory_space<vmem>>, vector<8x64xf32>
    %45 = arith.addf %44, %43 : vector<8x64xf32>
    %c0_9 = arith.constant 0 : index
    %c0_10 = arith.constant 0 : index
    %46 = vector.load %arg3[%c0_9, %c0_10] : memref<8x64xf32, #tpu.memory_space<vmem>>, vector<8x64xf32>
    tpu.vector_store %arg3[%c0_9, %c0_10], %45 {strides = array<i32>} : memref<8x64xf32, #tpu.memory_space<vmem>>, vector<8x64xf32>,
    return
  }
  func.func @transform_0(%arg0: i32, %arg1: i32) -> (i32, i32) {
    %c0_i32 = arith.constant 0 : i32
    return %arg0, %arg1 : i32, i32
  }
  func.func @transform_1(%arg0: i32, %arg1: i32) -> (i32, i32) {
    %c0_i32 = arith.constant 0 : i32
    return %arg0, %arg1 : i32, i32
  }
}

</mosaic_0001>

<bundles_post_ra>
// kernel: tpu_custom_call.1
= control target key start
LH: loop header
LB: loop body
LE: loop exit
PB: predicated region body
PF: predicated region fallthrough
CT: control target
= control target key end

     0   :  { %6 = vsyncpa [#allocation3], 0  ;;  %s312_s0 = inlined_call_operand.hbm [shape: f32[8,64], index: 0, kind: input, shape index: {}]   ;;  %s313_s1 = inlined_call_operand.hbm [shape: f32[8,64], index: 1, kind: output, shape index: {}]  }
   0x1   :  { %7 = vsyncpa [#allocation4], 0  ;;  %s248_s6 = smov [#allocation2]   ;;  %s200_s10 = scalar_lea.hbm %s312_s0, 128 }
   0x2   :  { %s14_s7 = sshll.u32 %s248_s6, 4  ;;  %p201_p0 = scmp.ne.s32.totalorder %s312_s0, %s200_s10  ;;  %s15_s7 = int_to_ptr.vmem [resolvable:$true] %s14_s7 }
   0x3   :  { %p204_p1 = scmp.lt.u32.totalorder %s200_s10, %s312_s0 }
   0x5   :  { %p206_p2 = pnand %p204_p1, %p201_p0 }
   0x7   :  { %209 = shalt.err (!%p206_p2)
}
   0x8   :  { %s210_s15 = scalar_lea.vmem %s15_s7, 128  ;;  %p215_p4 = scmp.lt.s32.totalorder %s15_s7, %s15_s7 }
   0x9   :  { %p211_p3 = scmp.ne.s32.totalorder %s15_s7, %s210_s15  ;;  %p216_p5 = scmp.lt.s32.totalorder %s210_s15, %s210_s15 }
   0xb   :  { %p217_p6 = por %p216_p5, %p215_p4 }
   0xd   :  { %p218_p7 = pnand %p217_p6, %p211_p3 }
   0xf   :  { %221 = shalt.err (!%p218_p7)
}
  0x10   :  { %17 = dma.hbm_to_vmem [thread:$0]  %s312_s0, 128, %s15_s7, [#allocation3]  }
  0x11   :  { %244 = dma.done.wait [#allocation3], 128  }
  0x12   :  { %245 = vsyncadd [#allocation3], 4294967168  ;;  %v23_v0 = vlaneseq  ;;  %v249_v11 = vmov 1.5707964   ;;  %v250_v26 = vmov 683565275  }
  0x13   :  { %v251_v28 = vmov 2475754826   ;;  %v252_v30 = vmov 2131351028   ;;  %v253_v32 = vmov 2102212464  }
  0x14   :  { %v29_v1 = vand.u32 127, %v23_v0  ;;  %v24_v7 = vshrl.u32 %v23_v0, 7  ;;  %v254_v34 = vmov 920167782   ;;  %v255_v41 = vmov 1326507024  }
  0x15   :  { %s256_s0 = smov [#allocation5]   ;;  %vm160_vm14 = vcmask 523264  }
  0x16   :  { %v36_v2 = vand.u32 31, %v29_v1  ;;  %v27_v9 = vcvt.s32.f32 %v24_v7  ;;  %s168_s18 = sshll.u32 %s256_s0, 4  ;;  %s169_s18 = int_to_ptr.vmem [resolvable:$true] %s168_s18 }
  0x17   :  { %s222_s19 = scalar_lea.vmem %s169_s18, 128  ;;  %p227_p9 = scmp.lt.s32.totalorder %s169_s18, %s169_s18 }
  0x18   :  { %v44_v3 = vshra.s32 %v36_v2, 1  ;;  %v49_v8 = vand.u32 1, %v36_v2  ;;  %p223_p8 = scmp.ne.s32.totalorder %s169_s18, %s222_s19  ;;  %p228_p10 = scmp.lt.s32.totalorder %s222_s19, %s222_s19 }
  0x1a   :  { %v45_v4 = vcvt.s32.f32 %v44_v3  ;;  %vm50_vm0 = vcmp.eq.s32.totalorder %v49_v8, 0  ;;  %p229_p11 = por %p228_p10, %p227_p9 }
  0x1b   :  { %v51_v12 = vsel %vm50_vm0, 0.0, %v249_v11 }
  0x1c   :  { %v46_v5 = vmul.f32 -0.5756463, %v45_v4  ;;  %p230_p12 = pnand %p229_p11, %p223_p8 }
  0x1e   :  { %v47_v6 = vmul.f32 1.442695, %v46_v5 }
  0x20   :  { %194 = vpow2.f32 %v47_v6 }
  0x2a   :  { %v195_v10 = vpop.eup %194 }
  0x2b   :  { %v52_v13 = vmul.f32 %v195_v10, %v27_v9 }
  0x2d   :  { %v279_v14 = vadd.f32 %v52_v13, %v51_v12 }
  0x2f   :  { %v57_v15 = vand.u32 2139095040, %v279_v14  ;;  %v54_v17 = vand.u32 2147483647, %v279_v14  ;;  %vm56_vm8 = vcmp.lt.s32.totalorder %v279_v14, 0  ;;  %vm146_vm13 = vweird.f32 %v279_v14 }
  0x31   :  { %v58_v16 = vshrl.u32 %v57_v15, 23  ;;  %v61_v20 = vand.u32 8388607, %v54_v17  ;;  %vm55_vm9 = vcmp.le.f32.partialorder %v54_v17, 0.7853982 }
  0x33   :  { %v177_v18 = vadd.s32 4294967169, %v58_v16  ;;  %v62_v23 = vor.u32 8388608, %v61_v20 }
  0x35   :  { %v64_v19 = vadd.s32 1, %v177_v18  ;;  %v102_v43 = vshll.u32 %v62_v23, 8 }
  0x37   :  { %vm65_vm1 = vcmp.gt.s32.totalorder %v64_v19, 0 }
  0x38   :  { %v66_v21 = vsel %vm65_vm1, %v64_v19, 0 }
  0x39   :  { %v68_v22 = vand.u32 31, %v66_v21  ;;  %v67_v24 = vshrl.u32 %v66_v21, 5 }
  0x3b   :  { %v69_v25 = vsub.s32 32, %v68_v22  ;;  %v71_v27 = vshll.u32 %v250_v26, %v68_v22  ;;  %v74_v29 = vshll.u32 %v251_v28, %v68_v22  ;;  %v77_v31 = vshll.u32 %v252_v30, %v68_v22 }
  0x3c   :  { %v80_v33 = vshll.u32 %v253_v32, %v68_v22  ;;  %v83_v35 = vshll.u32 %v254_v34, %v68_v22  ;;  %vm86_vm2 = vcmp.lt.s32.totalorder %v67_v24, 1  ;;  %vm89_vm3 = vcmp.lt.s32.totalorder %v67_v24, 4 }
  0x3d   :  { %v70_v36 = vshrl.u32 %v250_v26, %v69_v25  ;;  %v72_v37 = vshrl.u32 %v251_v28, %v69_v25  ;;  %v75_v38 = vshrl.u32 %v252_v30, %v69_v25  ;;  %v78_v39 = vshrl.u32 %v253_v32, %v69_v25 }
  0x3e   :  { %v81_v40 = vshrl.u32 %v254_v34, %v69_v25  ;;  %v84_v42 = vshrl.u32 %v255_v41, %v69_v25  ;;  %vm87_vm4 = vcmp.lt.s32.totalorder %v67_v24, 2  ;;  %vm88_vm5 = vcmp.lt.s32.totalorder %v67_v24, 3  ;;  %v158_v41 = vld [vmem:[#allocation2] sm:$0xff] }
  0x3f   :  { %v73_v44 = vor.u32 %v72_v37, %v71_v27  ;;  %v76_v45 = vor.u32 %v75_v38, %v74_v29  ;;  %v79_v46 = vor.u32 %v78_v39, %v77_v31 }
  0x40   :  { %v82_v47 = vor.u32 %v81_v40, %v80_v33  ;;  %v85_v48 = vor.u32 %v84_v42, %v83_v35 }
  0x41   :  { %v90_v49 = vsel %vm86_vm2, %v70_v36, %v73_v44  ;;  %v91_v50 = vsel %vm89_vm3, %v79_v46, 2102212464  ;;  %v94_v51 = vsel %vm86_vm2, %v73_v44, %v76_v45  ;;  %v98_v52 = vsel %vm86_vm2, %v76_v45, %v79_v46 }
  0x42   :  { %v92_v53 = vsel %vm88_vm5, %v76_v45, %v91_v50  ;;  %v95_v54 = vsel %vm89_vm3, %v82_v47, 920167782  ;;  %v99_v55 = vsel %vm89_vm3, %v85_v48, 1326507024 }
  0x43   :  { %v96_v56 = vsel %vm88_vm5, %v79_v46, %v95_v54  ;;  %v100_v57 = vsel %vm88_vm5, %v82_v47, %v99_v55  ;;  %v93_v58 = vsel %vm87_vm4, %v90_v49, %v92_v53 }
  0x44   :  { %v97_v59 = vsel %vm87_vm4, %v94_v51, %v96_v56  ;;  %v101_v60 = vsel %vm87_vm4, %v98_v52, %v100_v57  ;;  %v109_v1 = vmul.u32 %v102_v43, %v93_v58 }
  0x45   :  { %v285_v61 = vmul.u32.u64.low %v102_v43, %v101_v60  ;;  %v286_v62 = vmul.u32.u64.high %v102_v43, %v101_v60, %v285_v61  ;;  %v288_v63 = vmul.u32.u64.low %v102_v43, %v97_v59  ;;  %v289_v0 = vmul.u32.u64.high %v102_v43, %v97_v59, %v288_v63 }
  0x47   :  { %vm111_vm6 = vc.u32 %v286_v62, %v288_v63  ;;  %v112_v2 = vadd.s32 1, %v289_v0  ;;  %v110_v13 = vadd.s32 %v288_v63, %v286_v62 }
  0x49   :  { %v113_v3 = vsel %vm111_vm6, %v112_v2, %v289_v0 }
  0x4a   :  { %v114_v4 = vadd.s32 %v113_v3, %v109_v1 }
  0x4c   :  { %v115_v5 = vadd.s32 536870912, %v114_v4 }
  0x4e   :  { %v116_v6 = vshrl.u32 %v115_v5, 30 }
  0x50   :  { %v117_v7 = vshll.u32 %v116_v6, 30  ;;  %v140_v27 = vsub.s32 4, %v116_v6 }
  0x52   :  { %v118_v8 = vsub.s32 %v114_v4, %v117_v7  ;;  %v141_v30 = vsel %vm56_vm8, %v140_v27, %v116_v6 }
  0x53   :  { %v143_v33 = vsel %vm55_vm9, 0, %v141_v30 }
  0x54   :  { %v120_v9 = vsub.s32 0, %v118_v8  ;;  %v147_v34 = vadd.s32 3, %v143_v33 }
  0x56   :  { %v178_v10 = vmin.u32 %v120_v9, %v118_v8  ;;  %v148_v35 = vand.u32 3, %v147_v34 }
  0x58   :  { %v122_v11 = vclz %v178_v10  ;;  %vm153_vm10 = vcmp.eq.s32.totalorder %v148_v35, 2  ;;  %vm150_vm11 = vcmp.eq.s32.totalorder %v148_v35, 0  ;;  %vm149_vm12 = vcmp.lt.s32.totalorder %v148_v35, 2 }
  0x5a   :  { %v179_v12 = vadd.s32 4294967294, %v122_v11 }
  0x5c   :  { %vm180_vm7 = vcmp.lt.s32.totalorder %v179_v12, 0 }
  0x5d   :  { %v125_v15 = vsel %vm180_vm7, 0, %v179_v12 }
  0x5e   :  { %v126_v16 = vsub.s32 32, %v125_v15  ;;  %v127_v18 = vshll.u32 %v118_v8, %v125_v15  ;;  %v130_v19 = vsub.s32 4294967266, %v125_v15 }
  0x60   :  { %v128_v20 = vshrl.u32 %v110_v13, %v126_v16  ;;  %v131_v21 = vadd.s32 127, %v130_v19 }
  0x62   :  { %v129_v22 = vor.u32 %v128_v20, %v127_v18  ;;  %v132_v23 = vshll.u32 %v131_v21, 23 }
  0x64   :  { %v133_v24 = vor.u32 4788187, %v132_v23  ;;  %v136_v25 = vcvt.s32.f32 %v129_v22 }
  0x66   :  { %v134_v26 = vand.u32 2147483647, %v133_v24 }
  0x68   :  { %v137_v28 = vmul.f32 %v136_v25, %v134_v26 }
  0x6a   :  { %v138_v29 = vxor.u32 2147483648, %v137_v28 }
  0x6c   :  { %v139_v31 = vsel %vm56_vm8, %v138_v29, %v137_v28 }
  0x6d   :  { %v142_v32 = vsel %vm55_vm9, %v279_v14, %v139_v31 }
  0x6e   :  { %196 = vcosq.f32 %v142_v32 }
  0x6f   :  { %198 = vsinq.f32 %v142_v32 }
  0x78   :  { %v197_v36 = vpop.eup %196 }
  0x79   :  { %v199_v37 = vpop.eup %198  ;;  %v154_v38 = vxor.u32 2147483648, %v197_v36 }
  0x7a   :  { %v151_v39 = vxor.u32 2147483648, %v199_v37 }
  0x7b   :  { %v155_v17 = vsel %vm153_vm10, %v154_v38, %v199_v37 }
  0x7c   :  { %v152_v40 = vsel %vm150_vm11, %v197_v36, %v151_v39 }
  0x7d   :  { %v156_v42 = vsel %vm149_vm12, %v152_v40, %v155_v17 }
  0x7e   :  { %v157_v43 = vsel %vm146_vm13, nan, %v156_v42 }
  0x7f   :  { %v159_v44 = vadd.f32 %v158_v41, %v157_v43 }
  0x81   :  { %161 = vst.msk [vmem:[#allocation5] sm:$0xff] %vm160_vm14, %v159_v44 }
  0x82   :  { %233 = shalt.err (!%p230_p12)
}
  0x83   :  { %s234_s22 = scalar_lea.hbm %s313_s1, 128 }
  0x84   :  { %p235_p13 = scmp.ne.s32.totalorder %s313_s1, %s234_s22  ;;  %p238_p0 = scmp.lt.u32.totalorder %s234_s22, %s313_s1 }
  0x86   :  { %p240_p1 = pnand %p238_p0, %p235_p13 }
  0x88   :  { %243 = shalt.err (!%p240_p1)
}
  0x89   :  { %171 = dma.vmem_to_hbm [thread:$0]  %s169_s18, 128, %s313_s1, [#allocation4]  }
  0x8a   :  { %246 = dma.done.wait [#allocation4], 128  }
  0x8b   :  { %247 = vsyncadd [#allocation4], 4294967168 }
  0x8c   :  { %175 = vsyncpa [#allocation3], 1 }
  0x8d   :  { %176 = vsyncpa [#allocation4], 1 }

</bundles_post_ra>
